<compile_context>
chip_gen: v7x
topology: tpu7x:2x2x1
jax: 0.10.0
libtpu: 0.0.40
codegen_flags: <defaults>
</compile_context>

<pallas_src>
import functools

import numpy as np
import jax
import jax.numpy as jnp
from jax import lax
from jax.experimental import pallas as pl
from jax.experimental.pallas import tpu as pltpu


def _round_up(x, m):
    return ((x + m - 1) // m) * m


# --------------------------------------------------------------------------
# Path 1: resident table in VMEM, vectorized gather (select or one-hot MXU).
# --------------------------------------------------------------------------
def _resident_gather_kernel(idx_ref, table_ref, out_ref, *, count, use_mxu):
    """Gather table rows selected by idx into the current output block.

    idx_ref:   (block_b, 1) int32 in VMEM
    table_ref: (count_pad, d_pad) f32, resident in VMEM (constant index_map)
    out_ref:   (block_b, d_pad) f32 output block for grid step i
    """
    idx = idx_ref[...]                                   # (block_b, 1)
    if use_mxu:
        # One-hot matmul on the MXU: one lane-dense (block_b, d_pad) result
        # per grid step, full-vreg stores, no store-slot saturation.
        count_pad = table_ref.shape[0]
        one_hot = (lax.broadcasted_iota(jnp.int32, (idx.shape[0], count_pad), 1)
                   == idx).astype(table_ref.dtype)
        out_ref[...] = jnp.dot(
            one_hot, table_ref[...],
            preferred_element_type=jnp.float32).astype(out_ref.dtype)
        # TODO(synk): the f32 one-hot matmul goes through the MXU's bf16-split
        # decomposition; it should reproduce the table bits exactly (1.0 * x),
        # but if strict bit-exactness is required for large banks prefer the
        # select path or verify per-generation.
    else:
        # Exact count-way VPU select: bit-exact copy of the selected row.
        acc = jnp.zeros(out_ref.shape, out_ref.dtype)
        for r in range(count):                           # static, small count
            row = table_ref[pl.ds(r, 1), :]              # (1, d_pad) static slice
            acc = jnp.where(idx == r, row, acc)          # broadcast select
        out_ref[...] = acc


# --------------------------------------------------------------------------
# Path 2: table stays in HBM; per-row DMA gather directly into the out block.
# Used when the bank does not fit the VMEM budget (or b << count on big banks)
# so HBM read traffic is b*d instead of count*d.
# --------------------------------------------------------------------------
def _dma_gather_kernel(idx_smem, table_hbm, out_ref, sem):
    """idx_smem: (b_pad,) int32 scalar-prefetched to SMEM.
    table_hbm: (count_pad, d_pad) f32 left in HBM (memory_space=pl.ANY).
    out_ref:   (block_b, d_pad) f32 output block; rows are DMA targets.
    sem:       single DMA semaphore shared by all row copies of this block.
    """
    i = pl.program_id(0)
    nb = out_ref.shape[0]
    base = i * nb

    def _copy(j):
        row = idx_smem[base + j]
        return pltpu.make_async_copy(
            table_hbm.at[pl.ds(row, 1), :],
            out_ref.at[pl.ds(j, 1), :],
            sem)

    def _start(j, carry):
        _copy(j).start()
        return carry

    lax.fori_loop(0, nb, _start, None)          # all row DMAs in flight

    def _wait(j, carry):
        _copy(j).wait()
        return carry

    lax.fori_loop(0, nb, _wait, None)


class NeutralBank:
    """JAX/Pallas port of the PyTorch NeutralBank module (forward only)."""

    def __init__(self, count, shape, init_value, beta=0.9):
        self.count = int(count)
        self.shape = tuple(int(s) for s in shape)
        self.beta = beta
        self.d = int(np.prod(self.shape))

        flat = jnp.asarray(init_value, jnp.float32).reshape(-1)
        # Logical nn.Embedding weight: init_value broadcast over `count` rows.
        self.weight = jnp.broadcast_to(flat[None, :], (self.count, self.d))

        # Lane-dense padded copy used by the kernels: d -> multiple of 128 so
        # every output store is unmasked; count -> multiple of 8 for sublane
        # alignment. Zero padding keeps the one-hot MXU path exact.
        self._d_pad = _round_up(self.d, 128)
        self._count_pad = _round_up(self.count, 8)
        table = jnp.zeros((self._count_pad, self._d_pad), jnp.float32)
        self._table = table.at[:self.count, :self.d].set(self.weight)

    # ------------------------------------------------------------------ #
    def forward(self, index):
        index = jnp.asarray(index, jnp.int32).reshape(-1)
        # Clamp to the valid range: an out-of-range index would otherwise read
        # arbitrary memory silently (PyTorch's nn.Embedding would raise).
        index = jnp.clip(index, 0, self.count - 1)

        b = int(index.shape[0])
        d, d_pad, count_pad = self.d, self._d_pad, self._count_pad
        row_bytes = d_pad * 4
        table_bytes = count_pad * row_bytes

        # ---- block sizing: ~1 MiB output blocks, >=2 steps for v7x dual TC ----
        block_b = max(8, min(1024, _round_up(max(1, (1 << 20) // row_bytes), 8)))
        small_table = table_bytes <= (2 << 20)
        if small_table and b > 8:
            # Split the batch so both v7x TensorCores get work; skip for large
            # tables (each core would DMA its own resident table copy).
            block_b = min(block_b, max(8, _round_up(-(-b // 2), 8)))
        block_b = min(block_b, _round_up(b, 8))
        b_pad = _round_up(b, block_b)
        if b_pad != b:
            index = jnp.concatenate(
                [index, jnp.zeros((b_pad - b,), jnp.int32)])
        grid = (b_pad // block_b,)
        out_block_bytes = block_b * row_bytes

        # ---- VMEM budget & path selection (conservative: table may still be
        # double-buffered by the pipeline even with a constant index_map) ----
        try:
            vmem_cap = int(pltpu.get_tpu_info().vmem_capacity_bytes)
        except Exception:
            vmem_cap = 64 << 20            # v7x per-TC floor
        vmem_needed = (2 * table_bytes + 2 * out_block_bytes
                       + 2 * block_b * 512 + (2 << 20))
        resident_budget = min(int(0.30 * vmem_cap), 40 << 20)  # ~19 MiB on v7x
        gather_wins = table_bytes >= (8 << 20) and b_pad * 8 <= self.count
        use_resident = (vmem_needed <= resident_budget) and not gather_wins

        if use_resident:
            use_mxu = self.count > 32
            vmem_limit = None
            if vmem_needed > (16 << 20):
                vmem_limit = min(vmem_needed, vmem_cap - (4 << 20))

            out = pl.pallas_call(
                functools.partial(_resident_gather_kernel,
                                  count=self.count, use_mxu=use_mxu),
                out_shape=jax.ShapeDtypeStruct((b_pad, d_pad), jnp.float32),
                grid_spec=pltpu.PrefetchScalarGridSpec(
                    num_scalar_prefetch=0,
                    grid=grid,
                    in_specs=[
                        # Per-block index column (lane-dense VMEM input).
                        pl.BlockSpec((block_b, 1), lambda i: (i, 0)),
                        # Full table, constant block index -> DMA'd once, resident.
                        pl.BlockSpec((count_pad, d_pad), lambda i: (0, 0)),
                    ],
                    out_specs=pl.BlockSpec((block_b, d_pad), lambda i: (i, 0)),
                ),
                compiler_params=pltpu.CompilerParams(
                    dimension_semantics=("parallel",),   # shard batch over TCs
                    vmem_limit_bytes=vmem_limit,
                ),
                cost_estimate=pl.CostEstimate(
                    flops=(2 * b_pad * count_pad * d_pad) if use_mxu else 0,
                    transcendentals=0,
                    bytes_accessed=table_bytes + b_pad * row_bytes + b_pad * 4,
                ),
            )(index.reshape(b_pad, 1), self._table)
        else:
            # Bank too large for VMEM (or b << count on a big bank): gather the
            # needed rows straight from HBM with per-row DMAs.
            out = pl.pallas_call(
                _dma_gather_kernel,
                out_shape=jax.ShapeDtypeStruct((b_pad, d_pad), jnp.float32),
                grid_spec=pltpu.PrefetchScalarGridSpec(
                    num_scalar_prefetch=1,               # `index` -> SMEM
                    grid=grid,
                    in_specs=[pl.BlockSpec(memory_space=pl.ANY)],
                    out_specs=pl.BlockSpec((block_b, d_pad),
                                           lambda i, idx: (i, 0)),
                    scratch_shapes=[pltpu.SemaphoreType.DMA],
                ),
                compiler_params=pltpu.CompilerParams(
                    dimension_semantics=("arbitrary",),
                ),
                cost_estimate=pl.CostEstimate(
                    flops=0,
                    transcendentals=0,
                    bytes_accessed=2 * b_pad * row_bytes + b_pad * 4,
                ),
            )(index, self._table)

        out = out[:b, :d]
        return out.reshape((b,) + self.shape)

    __call__ = forward

    # TODO(synk): update() (torch.unique + scatter_add_ EMA) is not part of the
    # forward pass and is not implemented here.


if __name__ == "__main__":
    key = jax.random.PRNGKey(0)
    k_init, k_idx = jax.random.split(key)

    count = 8
    shape = (4, 16, 16)          # prod = 1024 (already lane-dense)
    batch = 6

    init_value = jax.random.normal(k_init, shape, dtype=jnp.float32)
    bank = NeutralBank(count, shape, init_value, beta=0.9)

    index = jax.random.randint(k_idx, (batch,), 0, count, dtype=jnp.int32)

    out = jax.block_until_ready(bank(index))

    # Pure-JAX reference: embedding lookup + unflatten.
    ref = bank.weight[index].reshape((batch,) + shape)
    assert out.shape == (batch,) + shape
    # The count<=32 select path is bit-exact.
    np.testing.assert_allclose(np.asarray(out), np.asarray(ref), rtol=0, atol=0)

    print("KERNEL_OK")
</pallas_src>

<mosaic_0001>
module attributes {stable_mosaic.version = 11 : i64} {
  func.func @_resident_gather_kernel(%arg0: i32, %arg1: memref<8x1xi32, #tpu.memory_space<vmem>>, %arg2: memref<8x1024xf32, #tpu.memory_space<vmem>>, %arg3: memref<8x1024xf32, #tpu.memory_space<vmem>>) attributes {dimension_semantics = [#tpu.dimension_semantics<parallel>], iteration_bounds = array<i64: 1>, scalar_prefetch = 0 : i64, scratch_operands = 0 : i64, tpu.core_type = #tpu.core_type<tc>, window_params = [{transform_indices = @transform_0, window_bounds = array<i64: 8, 1>}, {pipeline_mode = #tpu.pipeline_mode<synchronous>, transform_indices = @transform_1, window_bounds = array<i64: 8, 1024>}, {transform_indices = @transform_2, window_bounds = array<i64: 8, 1024>}]} {
    %c0 = arith.constant 0 : index
    %c0_0 = arith.constant 0 : index
    %0 = vector.load %arg1[%c0, %c0_0] : memref<8x1xi32, #tpu.memory_space<vmem>>, vector<8x1xi32>
    %cst = arith.constant 0.000000e+00 : f32
    %1 = vector.broadcast %cst : f32 to vector<8x1024xf32>
    %c0_1 = arith.constant 0 : index
    %c0_2 = arith.constant 0 : index
    %2 = vector.load %arg2[%c0_1, %c0_2] : memref<8x1024xf32, #tpu.memory_space<vmem>>, vector<1x1024xf32>
    %c0_i32 = arith.constant 0 : i32
    %3 = vector.broadcast %c0_i32 : i32 to vector<8x1xi32>
    %4 = arith.cmpi eq, %0, %3 : vector<8x1xi32>
    %5 = vector.shape_cast %4 : vector<8x1xi1> to vector<8x1xi1>
    %6 = vector.broadcast %5 : vector<8x1xi1> to vector<8x1024xi1>
    %7 = vector.shape_cast %2 : vector<1x1024xf32> to vector<1x1024xf32>
    %8 = vector.broadcast %7 : vector<1x1024xf32> to vector<8x1024xf32>
    %9 = arith.select %6, %8, %1 : vector<8x1024xi1>, vector<8x1024xf32>
    %c1 = arith.constant 1 : index
    %c0_3 = arith.constant 0 : index
    %10 = vector.load %arg2[%c1, %c0_3] : memref<8x1024xf32, #tpu.memory_space<vmem>>, vector<1x1024xf32>
    %c1_i32 = arith.constant 1 : i32
    %11 = vector.broadcast %c1_i32 : i32 to vector<8x1xi32>
    %12 = arith.cmpi eq, %0, %11 : vector<8x1xi32>
    %13 = vector.shape_cast %12 : vector<8x1xi1> to vector<8x1xi1>
    %14 = vector.broadcast %13 : vector<8x1xi1> to vector<8x1024xi1>
    %15 = vector.shape_cast %10 : vector<1x1024xf32> to vector<1x1024xf32>
    %16 = vector.broadcast %15 : vector<1x1024xf32> to vector<8x1024xf32>
    %17 = arith.select %14, %16, %9 : vector<8x1024xi1>, vector<8x1024xf32>
    %c2 = arith.constant 2 : index
    %c0_4 = arith.constant 0 : index
    %18 = vector.load %arg2[%c2, %c0_4] : memref<8x1024xf32, #tpu.memory_space<vmem>>, vector<1x1024xf32>
    %c2_i32 = arith.constant 2 : i32
    %19 = vector.broadcast %c2_i32 : i32 to vector<8x1xi32>
    %20 = arith.cmpi eq, %0, %19 : vector<8x1xi32>
    %21 = vector.shape_cast %20 : vector<8x1xi1> to vector<8x1xi1>
    %22 = vector.broadcast %21 : vector<8x1xi1> to vector<8x1024xi1>
    %23 = vector.shape_cast %18 : vector<1x1024xf32> to vector<1x1024xf32>
    %24 = vector.broadcast %23 : vector<1x1024xf32> to vector<8x1024xf32>
    %25 = arith.select %22, %24, %17 : vector<8x1024xi1>, vector<8x1024xf32>
    %c3 = arith.constant 3 : index
    %c0_5 = arith.constant 0 : index
    %26 = vector.load %arg2[%c3, %c0_5] : memref<8x1024xf32, #tpu.memory_space<vmem>>, vector<1x1024xf32>
    %c3_i32 = arith.constant 3 : i32
    %27 = vector.broadcast %c3_i32 : i32 to vector<8x1xi32>
    %28 = arith.cmpi eq, %0, %27 : vector<8x1xi32>
    %29 = vector.shape_cast %28 : vector<8x1xi1> to vector<8x1xi1>
    %30 = vector.broadcast %29 : vector<8x1xi1> to vector<8x1024xi1>
    %31 = vector.shape_cast %26 : vector<1x1024xf32> to vector<1x1024xf32>
    %32 = vector.broadcast %31 : vector<1x1024xf32> to vector<8x1024xf32>
    %33 = arith.select %30, %32, %25 : vector<8x1024xi1>, vector<8x1024xf32>
    %c4 = arith.constant 4 : index
    %c0_6 = arith.constant 0 : index
    %34 = vector.load %arg2[%c4, %c0_6] : memref<8x1024xf32, #tpu.memory_space<vmem>>, vector<1x1024xf32>
    %c4_i32 = arith.constant 4 : i32
    %35 = vector.broadcast %c4_i32 : i32 to vector<8x1xi32>
    %36 = arith.cmpi eq, %0, %35 : vector<8x1xi32>
    %37 = vector.shape_cast %36 : vector<8x1xi1> to vector<8x1xi1>
    %38 = vector.broadcast %37 : vector<8x1xi1> to vector<8x1024xi1>
    %39 = vector.shape_cast %34 : vector<1x1024xf32> to vector<1x1024xf32>
    %40 = vector.broadcast %39 : vector<1x1024xf32> to vector<8x1024xf32>
    %41 = arith.select %38, %40, %33 : vector<8x1024xi1>, vector<8x1024xf32>
    %c5 = arith.constant 5 : index
    %c0_7 = arith.constant 0 : index
    %42 = vector.load %arg2[%c5, %c0_7] : memref<8x1024xf32, #tpu.memory_space<vmem>>, vector<1x1024xf32>
    %c5_i32 = arith.constant 5 : i32
    %43 = vector.broadcast %c5_i32 : i32 to vector<8x1xi32>
    %44 = arith.cmpi eq, %0, %43 : vector<8x1xi32>
    %45 = vector.shape_cast %44 : vector<8x1xi1> to vector<8x1xi1>
    %46 = vector.broadcast %45 : vector<8x1xi1> to vector<8x1024xi1>
    %47 = vector.shape_cast %42 : vector<1x1024xf32> to vector<1x1024xf32>
    %48 = vector.broadcast %47 : vector<1x1024xf32> to vector<8x1024xf32>
    %49 = arith.select %46, %48, %41 : vector<8x1024xi1>, vector<8x1024xf32>
    %c6 = arith.constant 6 : index
    %c0_8 = arith.constant 0 : index
    %50 = vector.load %arg2[%c6, %c0_8] : memref<8x1024xf32, #tpu.memory_space<vmem>>, vector<1x1024xf32>
    %c6_i32 = arith.constant 6 : i32
    %51 = vector.broadcast %c6_i32 : i32 to vector<8x1xi32>
    %52 = arith.cmpi eq, %0, %51 : vector<8x1xi32>
    %53 = vector.shape_cast %52 : vector<8x1xi1> to vector<8x1xi1>
    %54 = vector.broadcast %53 : vector<8x1xi1> to vector<8x1024xi1>
    %55 = vector.shape_cast %50 : vector<1x1024xf32> to vector<1x1024xf32>
    %56 = vector.broadcast %55 : vector<1x1024xf32> to vector<8x1024xf32>
    %57 = arith.select %54, %56, %49 : vector<8x1024xi1>, vector<8x1024xf32>
    %c7 = arith.constant 7 : index
    %c0_9 = arith.constant 0 : index
    %58 = vector.load %arg2[%c7, %c0_9] : memref<8x1024xf32, #tpu.memory_space<vmem>>, vector<1x1024xf32>
    %c7_i32 = arith.constant 7 : i32
    %59 = vector.broadcast %c7_i32 : i32 to vector<8x1xi32>
    %60 = arith.cmpi eq, %0, %59 : vector<8x1xi32>
    %61 = vector.shape_cast %60 : vector<8x1xi1> to vector<8x1xi1>
    %62 = vector.broadcast %61 : vector<8x1xi1> to vector<8x1024xi1>
    %63 = vector.shape_cast %58 : vector<1x1024xf32> to vector<1x1024xf32>
    %64 = vector.broadcast %63 : vector<1x1024xf32> to vector<8x1024xf32>
    %65 = arith.select %62, %64, %57 : vector<8x1024xi1>, vector<8x1024xf32>
    %c0_10 = arith.constant 0 : index
    %c0_11 = arith.constant 0 : index
    %66 = vector.load %arg3[%c0_10, %c0_11] : memref<8x1024xf32, #tpu.memory_space<vmem>>, vector<8x1024xf32>
    tpu.vector_store %arg3[%c0_10, %c0_11], %65 {strides = array<i32>} : memref<8x1024xf32, #tpu.memory_space<vmem>>, vector<8x1024xf32>,
    return
  }
  func.func @transform_0(%arg0: i32) -> (i32, i32) {
    %c0_i32 = arith.constant 0 : i32
    %c0_i32_0 = arith.constant 0 : i32
    return %arg0, %c0_i32 : i32, i32
  }
  func.func @transform_1(%arg0: i32) -> (i32, i32) {
    %c0_i32 = arith.constant 0 : i32
    %c0_i32_0 = arith.constant 0 : i32
    %c0_i32_1 = arith.constant 0 : i32
    return %c0_i32, %c0_i32_0 : i32, i32
  }
  func.func @transform_2(%arg0: i32) -> (i32, i32) {
    %c0_i32 = arith.constant 0 : i32
    %c0_i32_0 = arith.constant 0 : i32
    return %arg0, %c0_i32 : i32, i32
  }
}

</mosaic_0001>

<bundles_post_ra>
// kernel: tpu_custom_call.1
= control target key start
LH: loop header
LB: loop body
LE: loop exit
PB: predicated region body
PF: predicated region fallthrough
CT: control target
= control target key end

     0   :  { %7 = vsyncpa [#allocation3], 0  ;;  %s997_s0 = inlined_call_operand.vmem [shape: s32[8,1], index: 0, kind: input, shape index: {}]   ;;  %s998_s1 = inlined_call_operand.hbm [shape: f32[8,1024], index: 1, kind: input, shape index: {}]   ;;  %s999_s2 = inlined_call_operand.hbm [shape: f32[8,1024], index: 2, kind: output, shape index: {}]  }
   0x1   :  { %8 = vsyncpa [#allocation4], 0  ;;  %s572_s9 = smov [#allocation2]   ;;  %s524_s13 = scalar_lea.hbm %s998_s1, 1024 }
   0x2   :  { %s17_s10 = sshll.u32 %s572_s9, 4  ;;  %p525_p0 = scmp.ne.s32.totalorder %s998_s1, %s524_s13  ;;  %s18_s10 = int_to_ptr.vmem [resolvable:$true] %s17_s10 }
   0x3   :  { %p528_p1 = scmp.lt.u32.totalorder %s524_s13, %s998_s1 }
   0x5   :  { %p530_p2 = pnand %p528_p1, %p525_p0 }
   0x7   :  { %533 = shalt.err (!%p530_p2)
}
   0x8   :  { %s534_s18 = scalar_lea.vmem %s18_s10, 1024  ;;  %p539_p4 = scmp.lt.s32.totalorder %s18_s10, %s18_s10 }
   0x9   :  { %p535_p3 = scmp.ne.s32.totalorder %s18_s10, %s534_s18  ;;  %p540_p5 = scmp.lt.s32.totalorder %s534_s18, %s534_s18 }
   0xb   :  { %p541_p6 = por %p540_p5, %p539_p4 }
   0xd   :  { %p542_p7 = pnand %p541_p6, %p535_p3 }
   0xf   :  { %545 = shalt.err (!%p542_p7)
}
  0x10   :  { %20 = dma.hbm_to_vmem [thread:$0]  %s998_s1, 1024, %s18_s10, [#allocation3]  }
  0x11   :  { %568 = dma.done.wait [#allocation3], 1024  }
  0x12   :  { %569 = vsyncadd [#allocation3], 4294966272  ;;  %v573_v0 = vmov 0   ;;  %v24_v1 = vld [vmem:[%s997_s0] sm:$0xff]  ;;  %v35_v10 = vlaneseq  ;;  %s574_s0 = smov [#allocation5]  }
  0x13   :  { %523 = vset.pattern.permute.xlu1 %v573_v0  ;;  %522 = vset.pattern.permute.xlu0 %v573_v0  ;;  %vm146_vm0 = vcmp.eq.s32.totalorder %v24_v1, 2  ;;  %vm28_vm1 = vcmp.eq.s32.totalorder %v24_v1, 0  ;;  %vm205_vm2 = vcmp.eq.s32.totalorder %v24_v1, 3  ;;  %vm87_vm3 = vcmp.eq.s32.totalorder %v24_v1, 1  ;;  %s510_s1 = sshll.u32 %s574_s0, 4  ;;  %s511_s1 = int_to_ptr.vmem [resolvable:$true] %s510_s1 }
  0x14   :  { %v147_v2 = vsel %vm146_vm0, 1, %v573_v0  ;;  %v29_v3 = vsel %vm28_vm1, 1, %v573_v0  ;;  %v206_v4 = vsel %vm205_vm2, 1, %v573_v0  ;;  %v88_v5 = vsel %vm87_vm3, 1, %v573_v0  ;;  %s546_s23 = scalar_lea.vmem %s511_s1, 1024  ;;  %p551_p9 = scmp.lt.s32.totalorder %s511_s1, %s511_s1 }
  0x15   :  { %149 = vperm.xlu1 %523, %v147_v2   ;;  %31 = vperm.xlu0 %522, %v29_v3   ;;  %vm323_vm4 = vcmp.eq.s32.totalorder %v24_v1, 5  ;;  %vm264_vm5 = vcmp.eq.s32.totalorder %v24_v1, 4  ;;  %vm441_vm6 = vcmp.eq.s32.totalorder %v24_v1, 7  ;;  %vm382_vm7 = vcmp.eq.s32.totalorder %v24_v1, 6  ;;  %p547_p8 = scmp.ne.s32.totalorder %s511_s1, %s546_s23  ;;  %p552_p10 = scmp.lt.s32.totalorder %s546_s23, %s546_s23 }
  0x16   :  { %v324_v6 = vsel %vm323_vm4, 1, %v573_v0  ;;  %v265_v7 = vsel %vm264_vm5, 1, %v573_v0  ;;  %v442_v8 = vsel %vm441_vm6, 1, %v573_v0  ;;  %v383_v9 = vsel %vm382_vm7, 1, %v573_v0 }
  0x17   :  { %v36_v11 = vshrl.u32 %v35_v10, 7  ;;  %v25_v12 = vld [vmem:[#allocation2] ss:$8 sm:$0xf]  ;;  %p553_p11 = por %p552_p10, %p551_p9 }
  0x18   :  { %v26_v13 = vld [vmem:[#allocation2] ss:$8 sm:$0xf0]  ;;  %v84_v19 = vld [vmem:[#allocation2 + $0x1] ss:$8 sm:$0xf] }
  0x19   :  { %208 = vperm.xlu1 %523, %v206_v4   ;;  %90 = vperm.xlu0 %522, %v88_v5   ;;  %v605_v14 = vsub.s32 0, %v36_v11  ;;  %v607_v15 = vsub.s32 1, %v36_v11  ;;  %v609_v16 = vsub.s32 2, %v36_v11  ;;  %v611_v17 = vsub.s32 3, %v36_v11  ;;  %p554_p12 = pnand %p553_p11, %p547_p8 }
  0x1a   :  { %v613_v18 = vor.u32 %v26_v13, %v25_v12  ;;  %v85_v20 = vld [vmem:[#allocation2 + $0x1] ss:$8 sm:$0xf0]  ;;  %v615_v21 = vsub.s32 4, %v36_v11  ;;  %v617_v22 = vsub.s32 5, %v36_v11  ;;  %v619_v23 = vsub.s32 6, %v36_v11 }
  0x1b   :  { %v621_v24 = vsub.s32 7, %v36_v11  ;;  %v143_v25 = vld [vmem:[#allocation2 + $0x2] ss:$8 sm:$0xf]  ;;  %v623_v27 = vor.u32 %v85_v20, %v84_v19 }
  0x1c   :  { %v144_v26 = vld [vmem:[#allocation2 + $0x2] ss:$8 sm:$0xf0]  ;;  %v202_v28 = vld [vmem:[#allocation2 + $0x3] ss:$8 sm:$0xf]  ;;  %v38_v30 = vrot.slane %v613_v18, %v605_v14  ;;  %v42_v31 = vrot.slane %v613_v18, %v607_v15  ;;  %v46_v32 = vrot.slane %v613_v18, %v609_v16  ;;  %v50_v33 = vrot.slane %v613_v18, %v611_v17 }
  0x1d   :  { %326 = vperm.xlu1 %523, %v324_v6   ;;  %267 = vperm.xlu0 %522, %v265_v7   ;;  %v203_v29 = vld [vmem:[#allocation2 + $0x3] ss:$8 sm:$0xf0]  ;;  %v54_v34 = vrot.slane %v613_v18, %v615_v21  ;;  %v635_v35 = vor.u32 %v144_v26, %v143_v25  ;;  %v58_v36 = vrot.slane %v613_v18, %v617_v22  ;;  %v261_v44 = vld [vmem:[#allocation2 + $0x4] ss:$8 sm:$0xf] }
  0x1e   :  { %v62_v37 = vrot.slane %v613_v18, %v619_v23  ;;  %v66_v38 = vrot.slane %v613_v18, %v621_v24  ;;  %v643_v39 = vor.u32 %v203_v29, %v202_v28  ;;  %v97_v40 = vrot.slane %v623_v27, %v605_v14  ;;  %v262_v45 = vld [vmem:[#allocation2 + $0x4] ss:$8 sm:$0xf0]  ;;  %v320_v50 = vld [vmem:[#allocation2 + $0x5] ss:$8 sm:$0xf] }
  0x1f   :  { %v101_v41 = vrot.slane %v623_v27, %v607_v15  ;;  %v105_v42 = vrot.slane %v623_v27, %v609_v16  ;;  %v109_v43 = vrot.slane %v623_v27, %v611_v17  ;;  %v113_v46 = vrot.slane %v623_v27, %v615_v21  ;;  %v321_v51 = vld [vmem:[#allocation2 + $0x5] ss:$8 sm:$0xf0]  ;;  %v379_v56 = vld [vmem:[#allocation2 + $0x6] ss:$8 sm:$0xf] }
  0x20   :  { %v117_v47 = vrot.slane %v623_v27, %v617_v22  ;;  %v121_v48 = vrot.slane %v623_v27, %v619_v23  ;;  %v125_v49 = vrot.slane %v623_v27, %v621_v24  ;;  %v156_v52 = vrot.slane %v635_v35, %v605_v14  ;;  %v380_v57 = vld [vmem:[#allocation2 + $0x6] ss:$8 sm:$0xf0]  ;;  %v438_v62 = vld [vmem:[#allocation2 + $0x7] ss:$8 sm:$0xf] }
  0x21   :  { %444 = vperm.xlu1 %523, %v442_v8   ;;  %385 = vperm.xlu0 %522, %v383_v9   ;;  %v160_v53 = vrot.slane %v635_v35, %v607_v15  ;;  %v164_v54 = vrot.slane %v635_v35, %v609_v16  ;;  %v168_v55 = vrot.slane %v635_v35, %v611_v17  ;;  %v439_v63 = vld [vmem:[#allocation2 + $0x7] ss:$8 sm:$0xf0] }
  0x22   :  { %v172_v58 = vrot.slane %v635_v35, %v615_v21  ;;  %v176_v59 = vrot.slane %v635_v35, %v617_v22  ;;  %v180_v60 = vrot.slane %v635_v35, %v619_v23  ;;  %v675_v61 = vor.u32 %v262_v45, %v261_v44 }
  0x23   :  { %v184_v0 = vrot.slane %v635_v35, %v621_v24  ;;  %v215_v1 = vrot.slane %v643_v39, %v605_v14  ;;  %v219_v2 = vrot.slane %v643_v39, %v607_v15  ;;  %v223_v3 = vrot.slane %v643_v39, %v609_v16 }
  0x24   :  { %v227_v4 = vrot.slane %v643_v39, %v611_v17  ;;  %v231_v5 = vrot.slane %v643_v39, %v615_v21  ;;  %v235_v6 = vrot.slane %v643_v39, %v617_v22  ;;  %v691_v7 = vor.u32 %v321_v51, %v320_v50 }
  0x25   :  { %v239_v8 = vrot.slane %v643_v39, %v619_v23  ;;  %v243_v9 = vrot.slane %v643_v39, %v621_v24  ;;  %v697_v10 = vor.u32 %v380_v57, %v379_v56  ;;  %v699_v11 = vor.u32 %v439_v63, %v438_v62 }
  0x26   :  { %v274_v12 = vrot.slane %v675_v61, %v605_v14  ;;  %v278_v13 = vrot.slane %v675_v61, %v607_v15  ;;  %v282_v19 = vrot.slane %v675_v61, %v609_v16  ;;  %v286_v20 = vrot.slane %v675_v61, %v611_v17 }
  0x27   :  { %v290_v25 = vrot.slane %v675_v61, %v615_v21  ;;  %v294_v26 = vrot.slane %v675_v61, %v617_v22  ;;  %v298_v28 = vrot.slane %v675_v61, %v619_v23  ;;  %v467_v35 = vrot.slane %v699_v11, %v615_v21 }
  0x94   :  { %v150_v44 = vpop.permute.xlu1 %149  ;;  %v32_v45 = vpop.permute.xlu0 %31 }
  0x95   :  { %vm33_vm8 = vcmp.eq.s32.totalorder %v32_v45, 1  ;;  %vm151_vm9 = vcmp.eq.s32.totalorder %v150_v44, 1  ;;  %v1000_v44 = vrot.slane %v675_v61, %v621_v24  ;;  %v1003_v61 = vrot.slane %v691_v7, %v609_v16 }
  0x96   :  { %v75_v63 = vsel %vm33_vm8, %v38_v30, 0.0  ;;  %v76_v50 = vsel %vm33_vm8, %v42_v31, 0.0  ;;  %v77_v56 = vsel %vm33_vm8, %v46_v32, 0.0  ;;  %v78_v57 = vsel %vm33_vm8, %v50_v33, 0.0 }
  0x97   :  { %v79_v30 = vsel %vm33_vm8, %v54_v34, 0.0  ;;  %v80_v31 = vsel %vm33_vm8, %v58_v36, 0.0  ;;  %v81_v32 = vsel %vm33_vm8, %v62_v37, 0.0  ;;  %v82_v33 = vsel %vm33_vm8, %v66_v38, 0.0 }
  0x98   :  { %v209_v51 = vpop.permute.xlu1 %208  ;;  %v91_v29 = vpop.permute.xlu0 %90 }
  0x99   :  { %vm210_vm10 = vcmp.eq.s32.totalorder %v209_v51, 1  ;;  %vm92_vm11 = vcmp.eq.s32.totalorder %v91_v29, 1 }
  0x9a   :  { %v134_v34 = vsel %vm92_vm11, %v97_v40, %v75_v63  ;;  %v135_v36 = vsel %vm92_vm11, %v101_v41, %v76_v50  ;;  %v136_v62 = vsel %vm92_vm11, %v105_v42, %v77_v56  ;;  %v137_v18 = vsel %vm92_vm11, %v109_v43, %v78_v57 }
  0x9b   :  { %v138_v37 = vsel %vm92_vm11, %v113_v46, %v79_v30  ;;  %v139_v38 = vsel %vm92_vm11, %v117_v47, %v80_v31  ;;  %v140_v40 = vsel %vm92_vm11, %v121_v48, %v81_v32  ;;  %v141_v41 = vsel %vm92_vm11, %v125_v49, %v82_v33 }
  0x9c   :  { %v193_v42 = vsel %vm151_vm9, %v156_v52, %v134_v34  ;;  %v194_v43 = vsel %vm151_vm9, %v160_v53, %v135_v36  ;;  %v195_v46 = vsel %vm151_vm9, %v164_v54, %v136_v62  ;;  %v196_v27 = vsel %vm151_vm9, %v168_v55, %v137_v18  ;;  %v327_v47 = vpop.permute.xlu1 %326  ;;  %v268_v48 = vpop.permute.xlu0 %267 }
  0x9d   :  { %v197_v49 = vsel %vm151_vm9, %v172_v58, %v138_v37  ;;  %v198_v52 = vsel %vm151_vm9, %v176_v59, %v139_v38  ;;  %v199_v53 = vsel %vm151_vm9, %v180_v60, %v140_v40  ;;  %v200_v54 = vsel %vm151_vm9, %v184_v0, %v141_v41 }
  0x9e   :  { %v252_v55 = vsel %vm210_vm10, %v215_v1, %v193_v42  ;;  %v253_v58 = vsel %vm210_vm10, %v219_v2, %v194_v43  ;;  %v254_v59 = vsel %vm210_vm10, %v223_v3, %v195_v46  ;;  %v255_v60 = vsel %vm210_vm10, %v227_v4, %v196_v27 }
  0x9f   :  { %v256_v0 = vsel %vm210_vm10, %v231_v5, %v197_v49  ;;  %v257_v1 = vsel %vm210_vm10, %v235_v6, %v198_v52  ;;  %v258_v2 = vsel %vm210_vm10, %v239_v8, %v199_v53  ;;  %vm328_vm12 = vcmp.eq.s32.totalorder %v327_v47, 1 }
  0xa0   :  { %v259_v3 = vsel %vm210_vm10, %v243_v9, %v200_v54  ;;  %vm269_vm13 = vcmp.eq.s32.totalorder %v268_v48, 1  ;;  %v445_v4 = vpop.permute.xlu1 %444  ;;  %v471_v5 = vrot.slane %v699_v11, %v617_v22  ;;  %v386_v45 = vpop.permute.xlu0 %385  ;;  %v1004_v57 = vrot.slane %v691_v7, %v611_v17 }
  0xa1   :  { %v311_v6 = vsel %vm269_vm13, %v274_v12, %v252_v55  ;;  %v312_v29 = vsel %vm269_vm13, %v278_v13, %v253_v58  ;;  %v313_v8 = vsel %vm269_vm13, %v282_v19, %v254_v59  ;;  %v314_v39 = vsel %vm269_vm13, %v286_v20, %v255_v60 }
  0xa2   :  { %v315_v9 = vsel %vm269_vm13, %v290_v25, %v256_v0  ;;  %v316_v12 = vsel %vm269_vm13, %v294_v26, %v257_v1  ;;  %v317_v13 = vsel %vm269_vm13, %v298_v28, %v258_v2  ;;  %v318_v19 = vsel %vm269_vm13, %v1000_v44, %v259_v3 }
  0xa3   :  { %vm446_vm14 = vcmp.eq.s32.totalorder %v445_v4, 1  ;;  %v1001_v20 = vrot.slane %v691_v7, %v605_v14  ;;  %v475_v25 = vrot.slane %v699_v11, %v619_v23  ;;  %v479_v26 = vrot.slane %v699_v11, %v621_v24 }
  0xa4   :  { %v1002_v28 = vrot.slane %v691_v7, %v607_v15  ;;  %v372_v56 = vsel %vm328_vm12, %v1003_v61, %v313_v8  ;;  %v373_v62 = vsel %vm328_vm12, %v1004_v57, %v314_v39  ;;  %v1005_v63 = vrot.slane %v691_v7, %v615_v21 }
  0xa5   :  { %v370_v50 = vsel %vm328_vm12, %v1001_v20, %v311_v6  ;;  %v1006_v31 = vrot.slane %v691_v7, %v617_v22  ;;  %v1007_v33 = vrot.slane %v691_v7, %v619_v23  ;;  %v1008_v36 = vrot.slane %v691_v7, %v621_v24 }
  0xa6   :  { %v371_v51 = vsel %vm328_vm12, %v1002_v28, %v312_v29  ;;  %v374_v30 = vsel %vm328_vm12, %v1005_v63, %v315_v9  ;;  %vm387_vm15 = vcmp.eq.s32.totalorder %v386_v45, 1  ;;  %v1009_v37 = vrot.slane %v697_v10, %v605_v14 }
  0xa7   :  { %v375_v32 = vsel %vm328_vm12, %v1006_v31, %v316_v12  ;;  %v376_v34 = vsel %vm328_vm12, %v1007_v33, %v317_v13  ;;  %v377_v18 = vsel %vm328_vm12, %v1008_v36, %v318_v19  ;;  %v1010_v40 = vrot.slane %v697_v10, %v607_v15 }
  0xa8   :  { %v429_v38 = vsel %vm387_vm15, %v1009_v37, %v370_v50  ;;  %v1011_v42 = vrot.slane %v697_v10, %v609_v16  ;;  %v1012_v7 = vrot.slane %v697_v10, %v611_v17  ;;  %v1013_v27 = vrot.slane %v697_v10, %v615_v21 }
  0xa9   :  { %v430_v41 = vsel %vm387_vm15, %v1010_v40, %v371_v51  ;;  %v1014_v48 = vrot.slane %v697_v10, %v617_v22  ;;  %v1015_v52 = vrot.slane %v697_v10, %v619_v23  ;;  %v1016_v54 = vrot.slane %v697_v10, %v621_v24 }
  0xaa   :  { %v431_v43 = vsel %vm387_vm15, %v1011_v42, %v372_v56  ;;  %v432_v46 = vsel %vm387_vm15, %v1012_v7, %v373_v62  ;;  %v433_v47 = vsel %vm387_vm15, %v1013_v27, %v374_v30  ;;  %v1017_v58 = vrot.slane %v699_v11, %v605_v14 }
  0xab   :  { %v434_v49 = vsel %vm387_vm15, %v1014_v48, %v375_v32  ;;  %v435_v53 = vsel %vm387_vm15, %v1015_v52, %v376_v34  ;;  %v436_v55 = vsel %vm387_vm15, %v1016_v54, %v377_v18  ;;  %v1018_v21 = vrot.slane %v699_v11, %v607_v15 }
  0xac   :  { %v488_v59 = vsel %vm446_vm14, %v1017_v58, %v429_v38  ;;  %v1019_v22 = vrot.slane %v699_v11, %v609_v16  ;;  %v1020_v0 = vrot.slane %v699_v11, %v611_v17  ;;  %v492_v14 = vsel %vm446_vm14, %v467_v35, %v433_v47 }
  0xad   :  { %v489_v60 = vsel %vm446_vm14, %v1018_v21, %v430_v41  ;;  %v493_v10 = vsel %vm446_vm14, %v471_v5, %v434_v49  ;;  %v494_v1 = vsel %vm446_vm14, %v475_v25, %v435_v53  ;;  %v495_v15 = vsel %vm446_vm14, %v479_v26, %v436_v55  ;;  %496 = vst [vmem:[#allocation5] sm:$0xff] %v488_v59 }
  0xae   :  { %v490_v23 = vsel %vm446_vm14, %v1019_v22, %v431_v43  ;;  %v491_v24 = vsel %vm446_vm14, %v1020_v0, %v432_v46  ;;  %497 = vst [vmem:[#allocation5 + $0x8] sm:$0xff] %v489_v60  ;;  %500 = vst [vmem:[#allocation5 + $0x20] sm:$0xff] %v492_v14 }
  0xaf   :  { %498 = vst [vmem:[#allocation5 + $0x10] sm:$0xff] %v490_v23  ;;  %499 = vst [vmem:[#allocation5 + $0x18] sm:$0xff] %v491_v24 }
  0xb0   :  { %501 = vst [vmem:[#allocation5 + $0x28] sm:$0xff] %v493_v10  ;;  %502 = vst [vmem:[#allocation5 + $0x30] sm:$0xff] %v494_v1 }
  0xb1   :  { %503 = vst [vmem:[#allocation5 + $0x38] sm:$0xff] %v495_v15 }
  0xb2   :  { %557 = shalt.err (!%p554_p12)
}
  0xb3   :  { %s558_s26 = scalar_lea.hbm %s999_s2, 1024 }
  0xb4   :  { %p559_p13 = scmp.ne.s32.totalorder %s999_s2, %s558_s26  ;;  %p562_p0 = scmp.lt.u32.totalorder %s558_s26, %s999_s2 }
  0xb6   :  { %p564_p1 = pnand %p562_p0, %p559_p13 }
  0xb8   :  { %567 = shalt.err (!%p564_p1)
}
  0xb9   :  { %513 = dma.vmem_to_hbm [thread:$0]  %s511_s1, 1024, %s999_s2, [#allocation4]  }
  0xba   :  { %570 = dma.done.wait [#allocation4], 1024  }
  0xbb   :  { %571 = vsyncadd [#allocation4], 4294966272 }
  0xbc   :  { %517 = vsyncpa [#allocation3], 1 }
  0xbd   :  { %518 = vsyncpa [#allocation4], 1 }

</bundles_post_ra>
